<compile_context>
chip_gen: v7x
topology: tpu7x:2x2x1
jax: 0.10.0
libtpu: 0.0.40
codegen_flags: <defaults>
</compile_context>

<pallas_src>
import math
import functools

import jax
import jax.numpy as jnp
from jax.experimental import pallas as pl
from jax.experimental.pallas import tpu as pltpu


def _round_up(a, b):
    return (a + b - 1) // b * b


def _arcmargin_kernel(x_ref, w_ref, label_ref, o_ref, *, s, cos_m, sin_m, th, mm,
                      easy_margin, compute_dtype):
    """One (class tile, batch tile) grid step.

    x_ref     : [TB, D]  raw features (normalized here on the small x tile)
    w_ref     : [TC, D]  PRE-normalized class weights (compute_dtype, bf16 default)
    label_ref : [TB, 1]  int32 targets (-1 for padded rows)
    o_ref     : [TB, TC] scaled ArcFace logits
    """
    # F.normalize(eps=1e-12): dividing by max(norm, eps) == multiplying by
    # rsqrt(max(sum_sq, eps^2)).
    eps2 = 1e-24

    xf = x_ref[...].astype(jnp.float32)                                   # [TB, D]
    inv_x = jax.lax.rsqrt(
        jnp.maximum(jnp.sum(xf * xf, axis=-1, keepdims=True), eps2))      # [TB, 1]
    # Scale x BEFORE the matmul (TB*D muls instead of TB*TC, and one less
    # dependent op after the MXU).  bf16 cast of a normalized tile is safe:
    # values are in [-1, 1] and bf16 shares f32's exponent range.
    xn = (xf * inv_x).astype(compute_dtype)                               # [TB, D]

    # cosine = x_n @ w_n^T : contract dim 1 with dim 1 -> MXU directly, no
    # materialized transpose of the weight tile; f32 accumulation.
    precision = (jax.lax.Precision.HIGHEST
                 if jnp.dtype(compute_dtype) == jnp.dtype(jnp.float32)
                 else jax.lax.Precision.DEFAULT)
    cosine = jax.lax.dot_general(
        xn, w_ref[...],
        dimension_numbers=(((1,), (1,)), ((), ())),
        precision=precision,
        preferred_element_type=jnp.float32)                               # [TB, TC]

    # sqrt(clamp(1 - cos^2, 0, 1)): the upper clamp is mathematically redundant,
    # a single maximum suffices (also guards bf16 rounding pushing cos^2 > 1).
    sine = jnp.sqrt(jnp.maximum(1.0 - cosine * cosine, 0.0))
    phi = cosine * cos_m - sine * sin_m
    if easy_margin:
        phi = jnp.where(cosine > 0.0, phi, cosine)
    else:
        phi = jnp.where(cosine > th, phi, cosine - mm)

    # One-hot select with a tile-local iota compared against (label - base)
    # (saves TB*TC adds vs. offsetting the whole iota by the class-tile base).
    tb, tc = cosine.shape
    base = pl.program_id(0) * tc              # class tiles are grid axis 0
    label_local = label_ref[...] - base       # [TB, 1]; padded labels (-1) never match
    class_iota = jax.lax.broadcasted_iota(jnp.int32, (tb, tc), 1)
    out = jnp.where(class_iota == label_local, phi, cosine) * s

    o_ref[...] = out.astype(o_ref.dtype)


def _vmem_bytes(tb, tc, D, x_item, w_item, out_item):
    """Rough pipelined working-set estimate for the chosen tiles."""
    return (2 * tc * D * w_item          # weight tile (double buffered)
            + 2 * tb * D * x_item        # x tile (double buffered)
            + 2 * tb * tc * out_item     # output tile (double buffered)
            + 2 * tb * 128 * 4           # label tile (lane padded)
            + 2 * tb * D * 4             # x f32 / compute-dtype temporaries
            + 5 * tb * tc * 4)           # epilogue f32 temporaries


@functools.partial(
    jax.jit,
    static_argnames=("s", "m", "easy_margin", "class_tile", "batch_tile",
                     "compute_dtype", "out_dtype"))
def arc_margin_product(x, weight, label, *, s=30.0, m=0.5, easy_margin=False,
                       class_tile=1024, batch_tile=256,
                       compute_dtype=jnp.bfloat16, out_dtype=jnp.float32):
    """x: [B, D], weight: [C, D], label: [B] int -> [B, C] ArcFace logits."""
    B, D = x.shape
    C, D2 = weight.shape
    assert D == D2, "in_features mismatch between x and weight"

    x_item = jnp.dtype(x.dtype).itemsize
    w_item = jnp.dtype(compute_dtype).itemsize     # weight is streamed pre-cast
    out_item = jnp.dtype(out_dtype).itemsize

    # ---- tile selection ----------------------------------------------------
    # Class tile: lane-dense multiple of 128. Batch tile: sublane multiple of 8
    # (default 256, a multiple of 128, matching the MXU on all generations).
    tc = _round_up(min(int(class_tile), _round_up(C, 128)), 128)
    tb = min(_round_up(B, 8), int(batch_tile))

    # Generation-aware VMEM budget (v7x: 64 MiB per TensorCore; v5e/v6e: 128 MiB).
    try:
        phys_vmem = int(pltpu.get_tpu_info().vmem_capacity_bytes)
    except Exception:
        phys_vmem = 64 << 20   # conservative fallback = v7x per-TC size
    usable = max(phys_vmem - (8 << 20), 24 << 20)

    # D-dependent guard: shrink the class tile (then the batch tile) until the
    # double-buffered working set fits, so pipelining survives on v7x for large D.
    while tc > 128 and _vmem_bytes(tb, tc, D, x_item, w_item, out_item) > int(0.75 * usable):
        tc = max(128, (tc // 2) // 128 * 128)
    while tb > 8 and _vmem_bytes(tb, tc, D, x_item, w_item, out_item) > int(0.75 * usable):
        tb = max(8, (tb // 2) // 8 * 8)

    C_pad = _round_up(C, tc)
    B_pad = _round_up(B, tb)
    n_ct = C_pad // tc
    n_bt = B_pad // tb

    # ---- one fused wrapper pass over the weight: normalize + cast + pad -----
    # (the whole wrapper is jitted, so this is a single HBM pass amortized over
    #  every batch tile instead of being redone per grid step inside the kernel).
    eps2 = 1e-24
    w32 = weight.astype(jnp.float32)
    inv_w = jax.lax.rsqrt(
        jnp.maximum(jnp.sum(w32 * w32, axis=-1, keepdims=True), eps2))
    w_p = jnp.pad((w32 * inv_w).astype(compute_dtype), ((0, C_pad - C), (0, 0)))

    x_p = jnp.pad(x, ((0, B_pad - B), (0, 0)))
    label2d = jnp.pad(label.reshape(B, 1).astype(jnp.int32),
                      ((0, B_pad - B), (0, 0)), constant_values=-1)

    kernel = functools.partial(
        _arcmargin_kernel,
        s=float(s), cos_m=math.cos(m), sin_m=math.sin(m),
        th=math.cos(math.pi - m), mm=math.sin(math.pi - m) * m,
        easy_margin=bool(easy_margin), compute_dtype=compute_dtype)

    est = _vmem_bytes(tb, tc, D, x_item, w_item, out_item)
    vmem_limit = int(min(max(est + (8 << 20), 24 << 20), usable))

    cost = pl.CostEstimate(
        flops=2 * B_pad * C_pad * D + 8 * B_pad * C_pad,
        transcendentals=B_pad * C_pad,                       # sqrt per logit
        bytes_accessed=(C_pad * D * w_item                   # weight read ~once
                        + n_ct * B_pad * D * x_item          # x re-read per class tile
                        + B_pad * C_pad * out_item           # output write
                        + B_pad * 4))                        # labels

    # Grid: class tiles OUTER, batch tiles INNER.  The weight block index only
    # depends on the outer axis, so each weight tile is fetched once and stays
    # resident while the inner batch loop runs (weight streams from HBM ~once).
    out = pl.pallas_call(
        kernel,
        out_shape=jax.ShapeDtypeStruct((B_pad, C_pad), out_dtype),
        grid=(n_ct, n_bt),
        in_specs=[
            pl.BlockSpec((tb, D), lambda j, i: (i, 0)),   # x       (streamed over i)
            pl.BlockSpec((tc, D), lambda j, i: (j, 0)),   # weight  (resident over i)
            pl.BlockSpec((tb, 1), lambda j, i: (i, 0)),   # labels
        ],
        out_specs=pl.BlockSpec((tb, tc), lambda j, i: (i, j)),
        compiler_params=pltpu.CompilerParams(
            dimension_semantics=("parallel", "parallel"),
            vmem_limit_bytes=vmem_limit),
        cost_estimate=cost,
    )(x_p, w_p, label2d)

    return out[:B, :C]


def _xavier_uniform(key, shape):
    fan_out, fan_in = shape
    limit = math.sqrt(6.0 / (fan_in + fan_out))
    return jax.random.uniform(key, shape, jnp.float32, -limit, limit)


def _reference(x, weight, label, *, s=30.0, m=0.5, easy_margin=False):
    eps = 1e-12
    xn = x / jnp.maximum(jnp.linalg.norm(x, axis=-1, keepdims=True), eps)
    wn = weight / jnp.maximum(jnp.linalg.norm(weight, axis=-1, keepdims=True), eps)
    cosine = xn @ wn.T
    sine = jnp.sqrt(jnp.clip(1.0 - cosine ** 2, 0.0, 1.0))
    phi = cosine * math.cos(m) - sine * math.sin(m)
    if easy_margin:
        phi = jnp.where(cosine > 0, phi, cosine)
    else:
        phi = jnp.where(cosine > math.cos(math.pi - m), phi,
                        cosine - math.sin(math.pi - m) * m)
    one_hot = jax.nn.one_hot(label, cosine.shape[1], dtype=jnp.float32)
    return (one_hot * phi + (1.0 - one_hot) * cosine) * s


if __name__ == "__main__":
    # Small but non-trivial shapes: B not a multiple of 8, C not a multiple of
    # 128, and a 3x3 tile grid in the first checks so the weight-residency and
    # tile-local one-hot-offset paths are exercised.
    B, D, C = 20, 128, 300
    key = jax.random.PRNGKey(0)
    kx, kw, kl = jax.random.split(key, 3)

    x = jax.random.normal(kx, (B, D), jnp.float32)
    weight = _xavier_uniform(kw, (C, D))
    label = jax.random.randint(kl, (B,), 0, C, jnp.int32)

    ok = True
    # f32 compute path: tight check of both margin branches across a multi-tile grid.
    for easy in (False, True):
        out = jax.block_until_ready(
            arc_margin_product(x, weight, label, s=30.0, m=0.5, easy_margin=easy,
                               class_tile=128, batch_tile=8,
                               compute_dtype=jnp.float32))
        ref = _reference(x, weight, label, s=30.0, m=0.5, easy_margin=easy)
        assert out.shape == (B, C)
        if not jnp.allclose(out, ref, atol=2e-3, rtol=2e-3):
            ok = False
            print("mismatch (f32, easy_margin=%s): max abs diff %e"
                  % (easy, float(jnp.max(jnp.abs(out - ref)))))

    # Default fast path: bf16 weights/activations on the MXU, f32 accumulation.
    out = jax.block_until_ready(
        arc_margin_product(x, weight, label, s=30.0, m=0.5, easy_margin=False))
    ref = _reference(x, weight, label, s=30.0, m=0.5, easy_margin=False)
    assert out.shape == (B, C)
    if not jnp.allclose(out, ref, atol=8e-2, rtol=8e-2):
        ok = False
        print("mismatch (bf16 default): max abs diff %e"
              % float(jnp.max(jnp.abs(out - ref))))

    assert ok, "kernel does not match reference"
    print("KERNEL_OK")
</pallas_src>

<mosaic_0001>
module attributes {stable_mosaic.version = 11 : i64} {
  func.func @_arcmargin_kernel(%arg0: i32, %arg1: i32, %arg2: memref<8x128xf32, #tpu.memory_space<vmem>>, %arg3: memref<128x128xf32, #tpu.memory_space<vmem>>, %arg4: memref<8x1xi32, #tpu.memory_space<vmem>>, %arg5: memref<8x128xf32, #tpu.memory_space<vmem>>) attributes {dimension_semantics = [#tpu.dimension_semantics<parallel>, #tpu.dimension_semantics<parallel>], iteration_bounds = array<i64: 3, 3>, scalar_prefetch = 0 : i64, scratch_operands = 0 : i64, tpu.core_type = #tpu.core_type<tc>, window_params = [{transform_indices = @transform_0, window_bounds = array<i64: 8, 128>}, {transform_indices = @transform_1, window_bounds = array<i64: 128, 128>}, {transform_indices = @transform_2, window_bounds = array<i64: 8, 1>}, {transform_indices = @transform_3, window_bounds = array<i64: 8, 128>}]} {
    %c0 = arith.constant 0 : index
    %c0_0 = arith.constant 0 : index
    %0 = vector.load %arg2[%c0, %c0_0] : memref<8x128xf32, #tpu.memory_space<vmem>>, vector<8x128xf32>
    %1 = arith.mulf %0, %0 : vector<8x128xf32>
    %cst = arith.constant dense<0.000000e+00> : vector<8xf32>
    %2 = vector.multi_reduction <add>, %1, %cst [1] : vector<8x128xf32> to vector<8xf32>
    %3 = vector.shape_cast %2 : vector<8xf32> to vector<8x1xf32>
    %cst_1 = arith.constant 1.000000e-24 : f32
    %4 = vector.broadcast %cst_1 : f32 to vector<8x1xf32>
    %5 = arith.maximumf %3, %4 : vector<8x1xf32>
    %6 = math.rsqrt %5 : vector<8x1xf32>
    %7 = vector.broadcast %6 : vector<8x1xf32> to vector<8x128xf32>
    %8 = arith.mulf %0, %7 : vector<8x128xf32>
    %c0_2 = arith.constant 0 : index
    %c0_3 = arith.constant 0 : index
    %9 = vector.load %arg3[%c0_2, %c0_3] : memref<128x128xf32, #tpu.memory_space<vmem>>, vector<128x128xf32>
    %cst_4 = arith.constant dense<0.000000e+00> : vector<8x128xf32>
    %10 = tpu.matmul %8, %9, %cst_4 {dimension_numbers = #tpu.dot_dimension_numbers<[1], [1], [0], [0], [0, 0, 1, 0], [], []>, precision = #tpu.contract_precision<fp32>} : vector<8x128xf32>, vector<128x128xf32>, vector<8x128xf32> -> vector<8x128xf32>
    %11 = arith.mulf %10, %10 : vector<8x128xf32>
    %cst_5 = arith.constant 1.000000e+00 : f32
    %12 = vector.broadcast %cst_5 : f32 to vector<8x128xf32>
    %13 = arith.subf %12, %11 : vector<8x128xf32>
    %cst_6 = arith.constant 0.000000e+00 : f32
    %14 = vector.broadcast %cst_6 : f32 to vector<8x128xf32>
    %15 = arith.maximumf %13, %14 : vector<8x128xf32>
    %16 = math.sqrt %15 : vector<8x128xf32>
    %cst_7 = arith.constant 0.87758255 : f32
    %17 = vector.broadcast %cst_7 : f32 to vector<8x128xf32>
    %18 = arith.mulf %10, %17 : vector<8x128xf32>
    %cst_8 = arith.constant 0.47942555 : f32
    %19 = vector.broadcast %cst_8 : f32 to vector<8x128xf32>
    %20 = arith.mulf %16, %19 : vector<8x128xf32>
    %21 = arith.subf %18, %20 : vector<8x128xf32>
    %cst_9 = arith.constant -0.87758255 : f32
    %22 = vector.broadcast %cst_9 : f32 to vector<8x128xf32>
    %23 = arith.cmpf ogt, %10, %22 : vector<8x128xf32>
    %cst_10 = arith.constant 0.239712775 : f32
    %24 = vector.broadcast %cst_10 : f32 to vector<8x128xf32>
    %25 = arith.subf %10, %24 : vector<8x128xf32>
    %26 = arith.select %23, %21, %25 : vector<8x128xi1>, vector<8x128xf32>
    %c128_i32 = arith.constant 128 : i32
    %27 = arith.muli %arg0, %c128_i32 : i32
    %c0_11 = arith.constant 0 : index
    %c0_12 = arith.constant 0 : index
    %28 = vector.load %arg4[%c0_11, %c0_12] : memref<8x1xi32, #tpu.memory_space<vmem>>, vector<8x1xi32>
    %29 = vector.broadcast %27 : i32 to vector<8x1xi32>
    %30 = arith.subi %28, %29 : vector<8x1xi32>
    %31 = tpu.iota {dimensions = array<i32: 1>} : vector<8x128xi32>
    %32 = vector.broadcast %30 : vector<8x1xi32> to vector<8x128xi32>
    %33 = arith.cmpi eq, %31, %32 : vector<8x128xi32>
    %34 = arith.select %33, %26, %10 : vector<8x128xi1>, vector<8x128xf32>
    %cst_13 = arith.constant 3.000000e+01 : f32
    %35 = vector.broadcast %cst_13 : f32 to vector<8x128xf32>
    %36 = arith.mulf %34, %35 : vector<8x128xf32>
    %c0_14 = arith.constant 0 : index
    %c0_15 = arith.constant 0 : index
    %37 = vector.load %arg5[%c0_14, %c0_15] : memref<8x128xf32, #tpu.memory_space<vmem>>, vector<8x128xf32>
    tpu.vector_store %arg5[%c0_14, %c0_15], %36 {strides = array<i32>} : memref<8x128xf32, #tpu.memory_space<vmem>>, vector<8x128xf32>,
    return
  }
  func.func @transform_0(%arg0: i32, %arg1: i32) -> (i32, i32) {
    %c0_i32 = arith.constant 0 : i32
    %c0_i32_0 = arith.constant 0 : i32
    return %arg1, %c0_i32 : i32, i32
  }
  func.func @transform_1(%arg0: i32, %arg1: i32) -> (i32, i32) {
    %c0_i32 = arith.constant 0 : i32
    %c0_i32_0 = arith.constant 0 : i32
    return %arg0, %c0_i32 : i32, i32
  }
  func.func @transform_2(%arg0: i32, %arg1: i32) -> (i32, i32) {
    %c0_i32 = arith.constant 0 : i32
    %c0_i32_0 = arith.constant 0 : i32
    return %arg1, %c0_i32 : i32, i32
  }
  func.func @transform_3(%arg0: i32, %arg1: i32) -> (i32, i32) {
    %c0_i32 = arith.constant 0 : i32
    return %arg1, %arg0 : i32, i32
  }
}

</mosaic_0001>

<bundles_post_ra>
// kernel: arc_margin_product.1
= control target key start
LH: loop header
LB: loop body
LE: loop exit
PB: predicated region body
PF: predicated region fallthrough
CT: control target
= control target key end

     0   :  { %8 = vsyncpa [#allocation3], 0  ;;  %s2071_s0 = inlined_call_operand.vmem [shape: f32[24,128], index: 0, kind: input, shape index: {}]   ;;  %s2072_s1 = inlined_call_operand.vmem [shape: f32[384,128], index: 1, kind: input, shape index: {}]   ;;  %s2073_s2 = inlined_call_operand.vmem [shape: s32[24,1], index: 2, kind: input, shape index: {}]   ;;  %s2074_s3 = inlined_call_operand.hbm [shape: f32[24,384], index: 3, kind: output, shape index: {}]  }
   0x1   :  { %10 = vsyncpa [#allocation3 + $0x1], 0  ;;  %s1707_s12 = smov 0   ;;  %s1709_s13 = smov 0  }
   0x2   :  { %s1711_s14 = smov 0   ;;  %s1713_s15 = smov 0  }
   0x3   :  { %s1715_s16 = smov 0   ;;  %s1717_s17 = smov 0  }
   0x4   :  { %s1719_s18 = smov 0   ;;  %s1721_s19 = smov 0  }
   0x5 LB: > { %s1024_s20 = sadd.s32 4294967295, %s1680_s19   ;;  %s1025_s21 = sadd.s32 4294967294, %s1680_s19   ;;  %s1680_s19 = sphi %s1721_s19, %s16_s19   ;;  %s1676_s18 = sphi %s1719_s18, %s2083_s18   ;;  %s1672_s17 = sphi %s1717_s17, %s2082_s17   ;;  %s1668_s16 = sphi %s1715_s16, %s2081_s16   ;;  %s1664_s15 = sphi %s1713_s15, %s2080_s15   ;;  %s1660_s14 = sphi %s1711_s14, %s2079_s14   ;;  %s1656_s13 = sphi %s1709_s13, %s2078_s13   ;;  %s1652_s12 = sphi %s1707_s12, %s2077_s12  }
   0x6   : > { %s25_s22 = sadd.s32 1, %s1672_s17  ;;  %s28_s23 = sadd.s32 1, %s1676_s18 }
   0x7   : > { %p26_p0 = scmp.ge.s32.totalorder %s25_s22, 3  ;;  %p125_p1 = scmp.ne.s32.totalorder %s1660_s14, %s1656_s13 }
   0x8   : > { %p126_p2 = scmp.eq.s32.totalorder %s1024_s20, 8  ;;  %p131_p5 = scmp.ne.s32.totalorder %s1656_s13, %s1652_s12 }
   0x9   : > { %s2085_s22 = smov (%p26_p0, %s25_s22), 0  ;;  %s2087_s23 = smov (!%p26_p0, %s28_s23), %s1676_s18 }
   0xa   : > { %s110_s24 = ssub.s32 %s1672_s17, %s2085_s22  ;;  %p1758_p3 = por %p126_p2, %p125_p1 }
   0xb   : > { %p30_p4 = scmp.ge.s32.totalorder %s2087_s23, 3  ;;  %p132_p6 = scmp.eq.s32.totalorder %s1025_s21, 8 }
   0xc   : > { %p1028_p7 = scmp.ge.s32.totalorder %s1680_s19, 1  ;;  %p173_p9 = scmp.lt.s32.totalorder %s1680_s19, 10 }
   0xd   : > { %s2089_s23 = smov (%p30_p4, %s2087_s23), 0  ;;  %p1767_p8 = por %p132_p6, %p131_p5 }
   0xe   : > { %s111_s27 = ssub.s32 %s1676_s18, %s2089_s23  ;;  %s115_s28 = sadd.s32 1, %s1660_s14 }
   0xf   : > { %s112_s29 = sor.u32 %s111_s27, %s110_s24  ;;  %p174_p10 = pnand %p1028_p7, %p173_p9 }
  0x10   : > { %p113_p11 = scmp.eq.s32.totalorder %s112_s29, 0  ;;  %p205_p12 = scmp.lt.s32.totalorder (!%p174_p10), %s1664_s15, 2  ;;  %v1682_v0 = vmov (!%p174_p10), 0.0|0.0   ;;  %vm1683_vm0 = vmmov (!%p174_p10), 0   ;;  %v1684_v51 = vmov (!%p174_p10), 0.0  }
  0x11   : > { %177 = sbr.rel (%p174_p10) target bundleno = 583 (0x247), region = 32  ;;  %s1031_s4 = sshll.u32 (!%p174_p10), %s1668_s16, 4  ;;  %1424 = vmatprep.subr.bf16.mxu0 (!%p174_p10), %v1682_v0  ;;  %1352 = vmatprep.subr.bf16.mxu1 (!%p174_p10), %v1682_v0 }
  0x12   : > { %s1776_s30 = scalar_select %p113_p11, %s1660_s14, %s115_s28  }
  0x13   : > { %p210_p13 = scmp.lt.s32.totalorder (!%p174_p10), %s1031_s4, 47  ;;  %1279 = vmatprep.mubr.msk.f32.mxu0 (!%p174_p10), %vm1683_vm0, %v1684_v51  ;;  %1174 = vmatprep.mubr.msk.f32.mxu1 (!%p174_p10), %vm1683_vm0, %v1684_v51  ;;  %s1035_s29 = sshll.u32 (!%p174_p10), %s1668_s16, 7 }
  0x14   : > { %s1686_s24 = smov (!%p174_p10), [#allocation2]  }
  0x15   : > { %s1590_s27 = sshll.u32 (!%p174_p10), %s1686_s24, 4  ;;  %s1591_s27 = int_to_ptr.vmem [resolvable:$false] %s1590_s27 }
  0x18   : > { %s1783_s5 = scalar_select %p205_p12, %s1664_s15, 2 }
  0x19   : > { %s2091_s4 = smov (!%p210_p13, %s1031_s4), 47 }
  0x1a   : > { %s1030_s6 = sshll.u32 %s1783_s5, 3  ;;  %s1032_s10 = sshll.u32 %s2091_s4, 3 }
  0x1b   : > { %s208_s9 = scalar_lea.vmem %s2071_s0, %s1030_s6  ;;  %s1798_s21 = scalar_lea.vmem %s2072_s1, %s1032_s10 }
  0x1c   : > { %v1791_v1 = vld [vmem:[%s208_s9] sm:$0xff]  ;;  %v227_v4 = vld [vmem:[%s1798_s21 + $0x8] sm:$0xff]  ;;  %v228_v5 = vld [vmem:[%s1798_s21 + $0x10] sm:$0xff]  ;;  %s218_s28 = scalar_lea.vmem %s2073_s2, %s1030_s6  ;;  %s202_s4 = sand.u32 1, %s1656_s13  }
  0x1d   : > { %v220_v2 = vmul.f32 %v1791_v1, %v1791_v1  ;;  %v226_v3 = vld [vmem:[%s1798_s21] sm:$0xff]  ;;  %v246_v7 = vand.u32 4294901760, %v227_v4  ;;  %v229_v8 = vld [vmem:[%s1798_s21 + $0x18] sm:$0xff]  ;;  %v249_v9 = vand.u32 4294901760, %v228_v5  ;;  %v231_v11 = vld [vmem:[%s1798_s21 + $0x28] sm:$0xff]  ;;  %s1505_s5 = smul.u32 3, %s1664_s15 }
  0x1e   : > { %v243_v6 = vand.u32 4294901760, %v226_v3  ;;  %v230_v10 = vld [vmem:[%s1798_s21 + $0x20] sm:$0xff]  ;;  %v252_v12 = vand.u32 4294901760, %v229_v8  ;;  %v258_v14 = vand.u32 4294901760, %v231_v11  ;;  %v232_v15 = vld [vmem:[%s1798_s21 + $0x30] sm:$0xff]  ;;  %v233_v16 = vld [vmem:[%s1798_s21 + $0x38] sm:$0xff] }
  0x1f   : > { %221 = vadd.xlane.f32.xlu0 %v220_v2  ;;  %v255_v13 = vand.u32 4294901760, %v230_v10  ;;  %v234_v17 = vld [vmem:[%s1798_s21 + $0x40] sm:$0xff]  ;;  %v1813_v20 = vsub.f32 %v227_v4, %v246_v7  ;;  %v1815_v21 = vsub.f32 %v228_v5, %v249_v9  ;;  %v235_v22 = vld [vmem:[%s1798_s21 + $0x48] sm:$0xff]  ;;  %v236_v23 = vld [vmem:[%s1798_s21 + $0x50] sm:$0xff]  ;;  %v261_v28 = vand.u32 4294901760, %v232_v15  ;;  %s1029_s6 = sshll.u32 %s202_s4, 3  ;;  %s924_s7 = sadd.s32 %s1668_s16, %s1505_s5 }
  0x20   : > { %v1809_v18 = vpack.c.bf16 %v246_v7, %v243_v6  ;;  %v1811_v19 = vsub.f32 %v226_v3, %v243_v6  ;;  %v1819_v24 = vsub.f32 %v229_v8, %v252_v12  ;;  %v237_v26 = vld [vmem:[%s1798_s21 + $0x58] sm:$0xff]  ;;  %v1826_v27 = vsub.f32 %v231_v11, %v258_v14  ;;  %v238_v41 = vld [vmem:[%s1798_s21 + $0x60] sm:$0xff]  ;;  %v239_v42 = vld [vmem:[%s1798_s21 + $0x68] sm:$0xff]  ;;  %s1037_s8 = sshll.u32 %s924_s7, 7  ;;  %s204_s9 = scalar_lea.vmem [#allocation2], %s1029_s6 }
  0x21   : > { %v1821_v25 = vsub.f32 %v230_v10, %v255_v13  ;;  %v264_v29 = vand.u32 4294901760, %v233_v16  ;;  %v267_v30 = vand.u32 4294901760, %v234_v17  ;;  %v270_v31 = vand.u32 4294901760, %v235_v22  ;;  %v240_v46 = vld [vmem:[%s1798_s21 + $0x70] sm:$0xff]  ;;  %v241_v47 = vld [vmem:[%s1798_s21 + $0x78] sm:$0xff]  ;;  %s928_s10 = sshll.u32 %s204_s9, 4  ;;  %s2018_s20 = scalar_lea.hbm %s2074_s3, %s1037_s8  ;;  %s2020_s10 = int_to_ptr.vmem [resolvable:$true] %s928_s10 }
  0x22   : > { %1426 = vmatpush3.bf16.xpose.msra.mxu0 %v1809_v18  ;;  %1354 = vmatpush3.bf16.xpose.msra.mxu1 %v1809_v18  ;;  %v273_v32 = vand.u32 4294901760, %v236_v23  ;;  %v1830_v33 = vsub.f32 %v232_v15, %v261_v28  ;;  %v276_v36 = vand.u32 4294901760, %v237_v26  ;;  %v1840_v39 = vpack.c.bf16 %v252_v12, %v249_v9  ;;  %s913_s16 = scalar_lea.sflag [#allocation3], %s202_s4  ;;  %s1586_s21 = scalar_lea.vmem %s2020_s10, 128 }
  0x23   : > { %1427 = vmatprep.subr.bf16.mxu0 %v1682_v0  ;;  %1355 = vmatprep.subr.bf16.mxu1 %v1682_v0  ;;  %v1832_v34 = vsub.f32 %v233_v16, %v264_v29  ;;  %v1834_v35 = vsub.f32 %v234_v17, %v267_v30  ;;  %v1836_v37 = vsub.f32 %v235_v22, %v270_v31  ;;  %v279_v43 = vand.u32 4294901760, %v238_v41  ;;  %v900_v22 = vld [vmem:[%s218_s28] sm:$0xff]  ;;  %p1587_p0 = scmp.ne.s32.totalorder %s2020_s10, %s1586_s21  ;;  %s1592_s28 = scalar_lea.vmem %s1591_s27, 256 }
  0x24   : > { %v1838_v38 = vsub.f32 %v236_v23, %v273_v32  ;;  %v1842_v40 = vsub.f32 %v237_v26, %v276_v36  ;;  %v282_v44 = vand.u32 4294901760, %v239_v42  ;;  %v1850_v45 = vpack.c.bf16 %v258_v14, %v255_v13  ;;  %p1593_p4 = scmp.lt.s32.totalorder %s2020_s10, %s1591_s27  ;;  %p1594_p5 = scmp.lt.s32.totalorder %s1592_s28, %s1586_s21 }
  0x25   : > { %v1854_v48 = vsub.f32 %v238_v41, %v279_v43  ;;  %v285_v50 = vand.u32 4294901760, %v240_v46  ;;  %v288_v52 = vand.u32 4294901760, %v241_v47  ;;  %v1870_v55 = vpack.c.bf16 %v264_v29, %v261_v28  ;;  %p1588_p1 = pnand %p1587_p0, %p1758_p3 }
  0x26   : > { %v1856_v49 = vsub.f32 %v239_v42, %v282_v44  ;;  %v1876_v56 = vpack.c.bf16 %v270_v31, %v267_v30  ;;  %v1882_v57 = vpack.c.bf16 %v276_v36, %v273_v32  ;;  %v1888_v58 = vpack.c.bf16 %v282_v44, %v279_v43  ;;  %p1595_p6 = por %p1594_p5, %p1593_p4 }
  0x27   : > { %v1862_v53 = vsub.f32 %v240_v46, %v285_v50  ;;  %v1866_v54 = vsub.f32 %v241_v47, %v288_v52  ;;  %v1894_v59 = vpack.c.bf16 %v288_v52, %v285_v50  ;;  %v336_v62 = vand.u32 4294901760, %v1811_v19  ;;  %p1589_p2 = pneg %p1588_p1 }
  0x28   : > { %v343_v63 = vand.u32 4294901760, %v1813_v20  ;;  %v350_v8 = vand.u32 4294901760, %v1815_v21  ;;  %v357_v12 = vand.u32 4294901760, %v1819_v24  ;;  %v364_v29 = vand.u32 4294901760, %v1821_v25 }
  0x29   : > { %v337_v4 = vsub.f32 %v1811_v19, %v336_v62  ;;  %v371_v30 = vand.u32 4294901760, %v1826_v27  ;;  %v901_v31 = vstv %s1035_s29  ;;  %v1685_v32 = vmov 0   ;;  %p1596_p7 = pnand %p1595_p6, %p1589_p2 }
  0x2a   : > { %1429 = vmatpush3.bf16.xpose.msra.mxu0 %v1840_v39  ;;  %1357 = vmatpush3.bf16.xpose.msra.mxu1 %v1840_v39  ;;  %v344_v5 = vsub.f32 %v1813_v20, %v343_v63  ;;  %v1449_v9 = vpack.c.bf16 %v343_v63, %v336_v62  ;;  %v351_v14 = vsub.f32 %v1815_v21, %v350_v8  ;;  %v378_v50 = vand.u32 4294901760, %v1830_v33 }
  0x2b   : > { %1430 = vmatprep.subr.bf16.mxu0 %v1682_v0  ;;  %1358 = vmatprep.subr.bf16.mxu1 %v1682_v0  ;;  %v338_v10 = vand.u32 4294901760, %v337_v4  ;;  %v358_v16 = vsub.f32 %v1819_v24, %v357_v12  ;;  %v1452_v23 = vpack.c.bf16 %v357_v12, %v350_v8  ;;  %v902_v36 = vsub.s32 %v900_v22, %v901_v31 }
  0x2c   : > { %v345_v11 = vand.u32 4294901760, %v344_v5  ;;  %v352_v26 = vand.u32 4294901760, %v351_v14  ;;  %1581 = vset.pattern.permute.xlu0 %v1685_v32  ;;  %v365_v42 = vsub.f32 %v1821_v25, %v364_v29  ;;  %v372_v43 = vsub.f32 %v1826_v27, %v371_v30 }
  0x2d   : > { %v359_v28 = vand.u32 4294901760, %v358_v16  ;;  %v1455_v44 = vpack.c.bf16 %v371_v30, %v364_v29  ;;  %v385_v52 = vand.u32 4294901760, %v1832_v34  ;;  %v392_v4 = vand.u32 4294901760, %v1834_v35 }
  0x2e   : > { %v1377_v15 = vpack.c.bf16 %v345_v11, %v338_v10  ;;  %v366_v46 = vand.u32 4294901760, %v365_v42  ;;  %v373_v47 = vand.u32 4294901760, %v372_v43  ;;  %v399_v5 = vand.u32 4294901760, %v1836_v37 }
  0x2f   : > { %v1380_v41 = vpack.c.bf16 %v359_v28, %v352_v26  ;;  %v386_v62 = vsub.f32 %v1832_v34, %v385_v52  ;;  %v1458_v63 = vpack.c.bf16 %v385_v52, %v378_v50  ;;  %v413_v14 = vand.u32 4294901760, %v1842_v40 }
  0x30   : > { %v400_v10 = vsub.f32 %v1836_v37, %v399_v5  ;;  %v1461_v11 = vpack.c.bf16 %v399_v5, %v392_v4  ;;  %v420_v28 = vand.u32 4294901760, %v1854_v48  ;;  %v427_v29 = vand.u32 4294901760, %v1856_v49 }
  0x31   : > { %v434_v43 = vand.u32 4294901760, %v1862_v53 }
  0x32   : > { %1432 = vmatpush3.bf16.xpose.msra.mxu0 %v1850_v45  ;;  %1360 = vmatpush3.bf16.xpose.msra.mxu1 %v1850_v45  ;;  %v421_v31 = vsub.f32 %v1854_v48, %v420_v28  ;;  %v428_v32 = vsub.f32 %v1856_v49, %v427_v29 }
  0x33   : > { %1433 = vmatprep.subr.bf16.mxu0 %v1682_v0  ;;  %1361 = vmatprep.subr.bf16.mxu1 %v1682_v0 }
  0x34   : > { %v429_v42 = vand.u32 4294901760, %v428_v32 }
  0x35   : > { %906 = vperm.xlu0 %1581, %v902_v36   ;;  %v1467_v36 = vpack.c.bf16 %v427_v29, %v420_v28 }
  0x3a   : > { %1435 = vmatpush3.bf16.xpose.msra.mxu0 %v1870_v55  ;;  %1363 = vmatpush3.bf16.xpose.msra.mxu1 %v1870_v55 }
  0x3b   : > { %1436 = vmatprep.subr.bf16.mxu0 %v1682_v0  ;;  %1364 = vmatprep.subr.bf16.mxu1 %v1682_v0 }
  0x42   : > { %1438 = vmatpush3.bf16.xpose.msra.mxu0 %v1876_v56  ;;  %1366 = vmatpush3.bf16.xpose.msra.mxu1 %v1876_v56 }
  0x43   : > { %1439 = vmatprep.subr.bf16.mxu0 %v1682_v0  ;;  %1367 = vmatprep.subr.bf16.mxu1 %v1682_v0 }
  0x4a   : > { %1441 = vmatpush3.bf16.xpose.msra.mxu0 %v1882_v57  ;;  %1369 = vmatpush3.bf16.xpose.msra.mxu1 %v1882_v57 }
  0x4b   : > { %1442 = vmatprep.subr.bf16.mxu0 %v1682_v0  ;;  %1370 = vmatprep.subr.bf16.mxu1 %v1682_v0 }
  0x52   : > { %1444 = vmatpush3.bf16.xpose.msra.mxu0 %v1888_v58  ;;  %1372 = vmatpush3.bf16.xpose.msra.mxu1 %v1888_v58 }
  0x53   : > { %1445 = vmatprep.subr.bf16.mxu0 %v1682_v0  ;;  %1373 = vmatprep.subr.bf16.mxu1 %v1682_v0 }
  0x5a   : > { %1447 = vmatpush3.bf16.xpose.msra.mxu0 %v1894_v59  ;;  %1375 = vmatpush3.bf16.xpose.msra.mxu1 %v1894_v59 }
  0x5b   : > { %1448 = vmatprep.subr.bf16.mxu0 %v1682_v0  ;;  %1376 = vmatprep.subr.bf16.mxu1 %v1682_v0 }
  0xac   : > { %v222_v60 = vpop.xlane.xlu0 %221 }
  0xad   : > { %v223_v61 = vmax.f32 %v222_v60, 1e-24  ;;  %v1383_v60 = vpack.c.bf16 %v373_v47, %v366_v46  ;;  %v435_v47 = vsub.f32 %v1862_v53, %v434_v43 }
  0xaf   : > { %1582 = vrsqrt.f32 %v223_v61  ;;  %v379_v61 = vsub.f32 %v1830_v33, %v378_v50 }
  0xb9   : > { %v1583_v2 = vpop.eup %1582 }
  0xba   : > { %v225_v3 = vmul.f32 %v1583_v2, %v1791_v1  ;;  %v380_v2 = vand.u32 4294901760, %v379_v61 }
  0xbc   : > { %v1905_v6 = vand.u32 4294901760, %v225_v3 }
  0xbe   : > { %v1908_v7 = vsub.f32 %v225_v3, %v1905_v6  ;;  %v387_v3 = vand.u32 4294901760, %v386_v62 }
  0xc0   : > { %v325_v13 = vand.u32 4294901760, %v1908_v7  ;;  %v1386_v8 = vpack.c.bf16 %v387_v3, %v380_v2 }
  0xc2   : > { %1280 = vmatmul.mubr.f32.vlgmr.msra.gmra.mrb[0].mxu0 %v325_v13  ;;  %v326_v1 = vsub.f32 %v1908_v7, %v325_v13  ;;  %v401_v13 = vand.u32 4294901760, %v400_v10 }
  0xc3   : > { %1450 = vmatpush3.bf16.xpose.msra.mxu0 %v1449_v9  ;;  %1314 = vmatprep.mubr.msk.f32.mxu0 %vm1683_vm0, %v1684_v51  ;;  %v393_v9 = vsub.f32 %v1834_v35, %v392_v4 }
  0xc4   : > { %v327_v17 = vand.u32 4294901760, %v326_v1  ;;  %1451 = vmatprep.subr.bf16.mxu0 %v1682_v0  ;;  %v406_v1 = vand.u32 4294901760, %v1838_v38 }
  0xc5   : > { %v394_v12 = vand.u32 4294901760, %v393_v9 }
  0xc6   : > { %1175 = vmatmul.mubr.f32.vlgmr.msra.gmra.mrb[0].mxu1 %v327_v17  ;;  %v407_v16 = vsub.f32 %v1838_v38, %v406_v1  ;;  %v414_v17 = vsub.f32 %v1842_v40, %v413_v14  ;;  %v1464_v22 = vpack.c.bf16 %v413_v14, %v406_v1 }
  0xc7   : > { %1378 = vmatpush3.bf16.xpose.msra.mxu1 %v1377_v15  ;;  %1209 = vmatprep.mubr.msk.f32.mxu1 %vm1683_vm0, %v1684_v51  ;;  %v1389_v15 = vpack.c.bf16 %v401_v13, %v394_v12 }
  0xc8   : > { %1379 = vmatprep.subr.bf16.mxu1 %v1682_v0  ;;  %v415_v26 = vand.u32 4294901760, %v414_v17 }
  0xcb   : > { %1453 = vmatpush3.bf16.xpose.msra.mxu0 %v1452_v23  ;;  %v408_v23 = vand.u32 4294901760, %v407_v16 }
  0xcc   : > { %1454 = vmatprep.subr.bf16.mxu0 %v1682_v0 }
  0xcd   : > { %v1392_v30 = vpack.c.bf16 %v415_v26, %v408_v23 }
  0xcf   : > { %1381 = vmatpush3.bf16.xpose.msra.mxu1 %v1380_v41  ;;  %v422_v41 = vand.u32 4294901760, %v421_v31 }
  0xd0   : > { %1382 = vmatprep.subr.bf16.mxu1 %v1682_v0 }
  0xd1   : > { %v1395_v46 = vpack.c.bf16 %v429_v42, %v422_v41 }
  0xd3   : > { %1456 = vmatpush3.bf16.xpose.msra.mxu0 %v1455_v44  ;;  %v441_v44 = vand.u32 4294901760, %v1866_v54 }
  0xd4   : > { %1457 = vmatprep.subr.bf16.mxu0 %v1682_v0 }
  0xd5   : > { %v442_v50 = vsub.f32 %v1866_v54, %v441_v44  ;;  %v1470_v52 = vpack.c.bf16 %v441_v44, %v434_v43 }
  0xd7   : > { %1384 = vmatpush3.bf16.xpose.msra.mxu1 %v1383_v60  ;;  %v436_v60 = vand.u32 4294901760, %v435_v47  ;;  %v443_v61 = vand.u32 4294901760, %v442_v50 }
  0xd8   : > { %1385 = vmatprep.subr.bf16.mxu1 %v1682_v0 }
  0xd9   : > { %v1398_v62 = vpack.c.bf16 %v443_v61, %v436_v60 }
  0xdb   : > { %1459 = vmatpush3.bf16.xpose.msra.mxu0 %v1458_v63  ;;  %v1401_v63 = vpack.c.bf16 %v1813_v20, %v1811_v19  ;;  %v1407_v19 = vpack.c.bf16 %v1826_v27, %v1821_v25  ;;  %v1410_v20 = vpack.c.bf16 %v1832_v34, %v1830_v33  ;;  %v1419_v25 = vpack.c.bf16 %v1856_v49, %v1854_v48 }
  0xdc   : > { %1460 = vmatprep.subr.bf16.mxu0 %v1682_v0  ;;  %v1422_v27 = vpack.c.bf16 %v1866_v54, %v1862_v53 }
  0xdf   : > { %1387 = vmatpush3.bf16.xpose.msra.mxu1 %v1386_v8 }
  0xe0   : > { %1388 = vmatprep.subr.bf16.mxu1 %v1682_v0 }
  0xe3   : > { %1462 = vmatpush3.bf16.xpose.msra.mxu0 %v1461_v11 }
  0xe4   : > { %1463 = vmatprep.subr.bf16.mxu0 %v1682_v0 }
  0xe7   : > { %1390 = vmatpush3.bf16.xpose.msra.mxu1 %v1389_v15 }
  0xe8   : > { %1391 = vmatprep.subr.bf16.mxu1 %v1682_v0 }
  0xeb   : > { %1465 = vmatpush3.bf16.xpose.msra.mxu0 %v1464_v22 }
  0xec   : > { %1466 = vmatprep.subr.bf16.mxu0 %v1682_v0 }
  0xef   : > { %1393 = vmatpush3.bf16.xpose.msra.mxu1 %v1392_v30 }
  0xf0   : > { %1394 = vmatprep.subr.bf16.mxu1 %v1682_v0 }
  0xf3   : > { %1468 = vmatpush3.bf16.xpose.msra.mxu0 %v1467_v36 }
  0xf4   : > { %1469 = vmatprep.subr.bf16.mxu0 %v1682_v0 }
  0xf7   : > { %1396 = vmatpush3.bf16.xpose.msra.mxu1 %v1395_v46 }
  0xf8   : > { %1397 = vmatprep.subr.bf16.mxu1 %v1682_v0 }
  0xfb   : > { %1471 = vmatpush3.bf16.xpose.msra.mxu0 %v1470_v52 }
  0xfc   : > { %1472 = vmatprep.subr.bf16.mxu0 %v1682_v0 }
  0xff   : > { %1399 = vmatpush3.bf16.xpose.msra.mxu1 %v1398_v62 }
 0x100   : > { %1400 = vmatprep.subr.bf16.mxu1 %v1682_v0 }
 0x102   : > { %1315 = vmatmul.mubr.f32.vlgmr.msra.gmra.mrb[0].mxu0 %v1905_v6 }
 0x103   : > { %1474 = vmatpush3.bf16.xpose.msra.mxu0 %v1809_v18  ;;  %1349 = vmatprep.mubr.msk.f32.mxu0 %vm1683_vm0, %v1684_v51  ;;  %v1404_v18 = vpack.c.bf16 %v1819_v24, %v1815_v21  ;;  %v1413_v21 = vpack.c.bf16 %v1836_v37, %v1834_v35  ;;  %v1416_v24 = vpack.c.bf16 %v1842_v40, %v1838_v38 }
 0x104   : > { %1475 = vmatprep.subr.bf16.mxu0 %v1682_v0 }
 0x106   : > { %1210 = vmatmul.mubr.f32.vlgmr.msra.gmra.mrb[0].mxu1 %v1905_v6 }
 0x107   : > { %1402 = vmatpush3.bf16.xpose.msra.mxu1 %v1401_v63  ;;  %1244 = vmatprep.mubr.msk.f32.mxu1 %vm1683_vm0, %v1684_v51 }
 0x108   : > { %1403 = vmatprep.subr.bf16.mxu1 %v1682_v0 }
 0x10b   : > { %1477 = vmatpush3.bf16.xpose.msra.mxu0 %v1840_v39 }
 0x10c   : > { %1478 = vmatprep.subr.bf16.mxu0 %v1682_v0 }
 0x10f   : > { %1405 = vmatpush3.bf16.xpose.msra.mxu1 %v1404_v18 }
 0x110   : > { %1406 = vmatprep.subr.bf16.mxu1 %v1682_v0 }
 0x113   : > { %1480 = vmatpush3.bf16.xpose.msra.mxu0 %v1850_v45  ;;  %v903_v45 = vlaneseq }
 0x114   : > { %1481 = vmatprep.subr.bf16.mxu0 %v1682_v0 }
 0x115   : > { %v904_v54 = vand.u32 127, %v903_v45 }
 0x117   : > { %1408 = vmatpush3.bf16.xpose.msra.mxu1 %v1407_v19 }
 0x118   : > { %1409 = vmatprep.subr.bf16.mxu1 %v1682_v0 }
 0x11b   : > { %1483 = vmatpush3.bf16.xpose.msra.mxu0 %v1870_v55 }
 0x11c   : > { %1484 = vmatprep.subr.bf16.mxu0 %v1682_v0 }
 0x11f   : > { %1411 = vmatpush3.bf16.xpose.msra.mxu1 %v1410_v20 }
 0x120   : > { %1412 = vmatprep.subr.bf16.mxu1 %v1682_v0 }
 0x123   : > { %1486 = vmatpush3.bf16.xpose.msra.mxu0 %v1876_v56  ;;  %v907_v56 = vpop.permute.xlu0 %906 }
 0x124   : > { %1487 = vmatprep.subr.bf16.mxu0 %v1682_v0  ;;  %vm908_vm3 = vcmp.eq.s32.totalorder %v904_v54, %v907_v56 }
 0x127   : > { %1414 = vmatpush3.bf16.xpose.msra.mxu1 %v1413_v21 }
 0x128   : > { %1415 = vmatprep.subr.bf16.mxu1 %v1682_v0 }
 0x12b   : > { %1489 = vmatpush3.bf16.xpose.msra.mxu0 %v1882_v57 }
 0x12c   : > { %1490 = vmatprep.subr.bf16.mxu0 %v1682_v0 }
 0x12f   : > { %1417 = vmatpush3.bf16.xpose.msra.mxu1 %v1416_v24 }
 0x130   : > { %1418 = vmatprep.subr.bf16.mxu1 %v1682_v0 }
 0x133   : > { %1492 = vmatpush3.bf16.xpose.msra.mxu0 %v1888_v58 }
 0x134   : > { %1493 = vmatprep.subr.bf16.mxu0 %v1682_v0 }
 0x137   : > { %1420 = vmatpush3.bf16.xpose.msra.mxu1 %v1419_v25 }
 0x138   : > { %1421 = vmatprep.subr.bf16.mxu1 %v1682_v0 }
 0x13b   : > { %1495 = vmatpush3.bf16.xpose.msra.mxu0 %v1894_v59 }
 0x13f   : > { %1423 = vmatpush3.bf16.xpose.msra.mxu1 %v1422_v27 }
 0x142   : > { %1350 = vmatmul.mubr.f32.vlgmr.msra.gmra.mrb[0].mxu0 %v1905_v6 }
 0x146   : > { %1245 = vmatmul.mubr.f32.vlgmr.msra.gmra.mrb[0].mxu1 %v1908_v7 }
 0x215   : > { %v879_v33 = vpop.f32.mrb[0].mxu0 }
 0x216   : > { %v1351_v34 = vpop.f32.mrb[1].mxu0 }
 0x219   : > { %v584_v35 = vpop.f32.mrb[0].mxu1 }
 0x21a   : > { %v1496_v37 = vadd.f32 %v879_v33, %v584_v35  ;;  %v1246_v38 = vpop.f32.mrb[1].mxu1 }
 0x21c   : > { %v883_v39 = vmul.f32 %v1496_v37, %v1496_v37  ;;  %v893_v57 = vmul.f32 0.87758255, %v1496_v37  ;;  %v1034_v6 = vadd.f32 -0.23971277, %v1496_v37  ;;  %vm896_vm4 = vcmp.gt.f32.partialorder %v1496_v37, -0.87758255 }
 0x21e   : > { %v884_v40 = vsub.f32 1.0, %v883_v39 }
 0x220   : > { %v885_v0 = vmax.f32 %v884_v40, 0.0 }
 0x222   : > { %1584 = vrsqrt.f32 %v885_v0  ;;  %vm888_vm1 = vcmp.eq.f32.partialorder %v885_v0, inf  ;;  %v891_v51 = vand.u32 2147483648, %v885_v0  ;;  %vm890_vm2 = vcmp.eq.f32.partialorder %v885_v0, 0.0 }
 0x22c   : > { %v1585_v48 = vpop.eup %1584 }
 0x22d   : > { %v887_v49 = vmul.f32 %v1585_v48, %v885_v0 }
 0x22f   : > { %v889_v53 = vsel %vm888_vm1, %v885_v0, %v887_v49 }
 0x230   : > { %v892_v55 = vsel %vm890_vm2, %v891_v51, %v889_v53 }
 0x231   : > { %v894_v58 = vmul.f32 0.47942555, %v892_v55 }
 0x233   : > { %v895_v59 = vsub.f32 %v893_v57, %v894_v58 }
 0x235   : > { %v898_v7 = vsel %vm896_vm4, %v895_v59, %v1034_v6 }
 0x236   : > { %v909_v2 = vsel %vm908_vm3, %v898_v7, %v1496_v37 }
 0x237   : > { %v910_v3 = vmul.f32 30.0, %v909_v2 }
 0x239   : > { %911 = vst [vmem:[%s204_s9] sm:$0xff] %v910_v3 }
 0x23a   : > { %1599 = shalt.err (!%p1596_p7)
}
 0x23b   : > { %s1600_s29 = scalar_lea.hbm %s2018_s20, 128  ;;  %s1604_s6 = scalar_lea.hbm %s2074_s3, 1152 }
 0x23c   : > { %p1601_p9 = scmp.ne.s32.totalorder %s2018_s20, %s1600_s29  ;;  %p1605_p12 = scmp.lt.u32.totalorder %s2018_s20, %s2074_s3 }
 0x23d   : > { %p1606_p13 = scmp.lt.u32.totalorder %s1604_s6, %s1600_s29  ;;  %p1608_p1 = scmp.lt.u32.totalorder %s1600_s29, %s2018_s20 }
 0x23e   : > { %p1602_p10 = pnand %p1601_p9, %p1758_p3 }
 0x23f   : > { %p1607_p0 = por %p1606_p13, %p1605_p12 }
 0x240   : > { %p1603_p11 = pneg %p1602_p10 }
 0x241   : > { %p1609_p2 = por %p1608_p1, %p1607_p0 }
 0x243   : > { %p1610_p4 = pnand %p1609_p2, %p1603_p11 }
 0x245   : > { %1613 = shalt.err (!%p1610_p4)
}
 0x246   : > { %1506 = dma.vmem_to_hbm [thread:$0]  (%p1758_p3), %s2020_s10, 128, %s2018_s20, %s913_s16  }
 0x247 PF: > { %p1512_p5 = scmp.ge.s32.totalorder %s1680_s19, 2  ;;  %s940_s9 = sand.u32 1, %s1652_s12  }
 0x248   : > { %s941_s15 = scalar_lea.sflag [#allocation3], %s940_s9 }
 0x249   : > { %p1509_p6 = pnand %p1512_p5, %p1767_p8 }
 0x24b   : > { %1647 = dma.done.wait (!%p1509_p6), %s941_s15, 128  }
 0x24c   : > { %1649 = vsyncadd (!%p1509_p6), %s941_s15, 4294967168  ;;  %s16_s19 = sadd.s32 1, %s1680_s19   ;;  %s2077_s12 = smov %s1656_s13 }
 0x24d   : > { %p13_p7 = scmp.ge.s32.totalorder %s16_s19, 11   ;;  %s2078_s13 = smov %s1660_s14 }
 0x24e   : > { %s2079_s14 = smov %s1776_s30  ;;  %s2080_s15 = smov %s1672_s17 }
 0x24f   : > { %s2081_s16 = smov %s1676_s18  ;;  %s2082_s17 = smov %s2085_s22 }
 0x250   : > { %s2083_s18 = smov %s2089_s23  ;;  %15 = sbr.rel (!%p13_p7) target bundleno = 5 (0x5), region = 73 }
 0x257   :  { %946 = vsyncpa [#allocation3], 1 }
 0x258   :  { %948 = vsyncpa [#allocation3 + $0x1], 1 }

</bundles_post_ra>
